<compile_context>
chip_gen: v5e
topology: v5e:2x2
jax: 0.10.0
libtpu: 0.0.40
codegen_flags: <defaults>
</compile_context>

<pallas_src>
import math

import jax
import jax.numpy as jnp
from jax.experimental import pallas as pl
from jax.experimental.pallas import tpu as pltpu

LN_EPS = 1e-5  # torch.nn.LayerNorm default


# ---------------------------------------------------------------------------
# fused kernel
# ---------------------------------------------------------------------------
def _make_fused_kernel(depth: int, has_out: bool):
    """Whole tempMLP forward for one (tm, lanes) row tile; depth unrolled statically."""

    def kernel(x_ref, m_ref, g1_ref, b1_ref, w1_ref, g2_ref, b2_ref, w2_ref, *rest):
        if has_out:
            wo_ref, o_ref = rest
        else:
            (o_ref,) = rest

        lanes = x_ref.shape[-1]

        def seg_stats(v):
            # Segmented mean / mean-of-squares over each width-lane group via bf16 MXU
            # dots (f32 accumulate).  M is read from VMEM per call so it is not pinned
            # in vregs across the unrolled depth loop.
            m = m_ref[...]                                       # (lanes, lanes) bf16
            mu = jnp.dot(v.astype(jnp.bfloat16), m,
                         preferred_element_type=jnp.float32)
            msq = jnp.dot((v * v).astype(jnp.bfloat16), m,
                          preferred_element_type=jnp.float32)
            return mu, msq

        def ln_finish(v, mu, msq, g, b):
            # var = E[x^2] - mu^2 (decoupled stat dots); clamp guards bf16 rounding.
            var = jnp.maximum(msq - mu * mu, 0.0)
            return (v - mu) * jax.lax.rsqrt(var + LN_EPS) * g + b

        x = x_ref[...]                                           # (tm, lanes) f32
        for d in range(depth):  # static unroll; all weights resident in VMEM
            # norm1 + relu
            mu1, msq1 = seg_stats(x)
            h = jnp.maximum(ln_finish(x, mu1, msq1, g1_ref[d], b1_ref[d]), 0.0)
            # fc1 (bias=False) fused with norm2's mean: RHS = [W1 | W1 @ M]
            hw = jnp.dot(h.astype(jnp.bfloat16), w1_ref[d],
                         preferred_element_type=jnp.float32)     # (tm, 2*lanes)
            h1, mu2 = hw[:, :lanes], hw[:, lanes:]
            # dropout: rate 0 / eval mode -> identity
            # norm2 (only the E[x^2] stat dot remains) + relu
            msq2 = jnp.dot((h1 * h1).astype(jnp.bfloat16), m_ref[...],
                           preferred_element_type=jnp.float32)
            h2 = jnp.maximum(ln_finish(h1, mu2, msq2, g2_ref[d], b2_ref[d]), 0.0)
            # fc2 (bias=False)
            h3 = jnp.dot(h2.astype(jnp.bfloat16), w2_ref[d],
                         preferred_element_type=jnp.float32)
            # residual + relu
            x = jnp.maximum(h3 + x, 0.0)

        if has_out:
            x = jnp.dot(x.astype(jnp.bfloat16), wo_ref[...],     # output Linear
                        preferred_element_type=jnp.float32)
        # TODO(synk): when pack*output_dims < 128 this store is lane-sparse (masked
        # vst); only matters if the regime ever becomes store-bound.
        o_ref[...] = x.astype(o_ref.dtype)

    return kernel


# ---------------------------------------------------------------------------
# wrapper / tiling
# ---------------------------------------------------------------------------
def _round_up(a, b):
    return (a + b - 1) // b * b


def _pack_factor(width):
    # TODO(synk): widths that do not divide 128 fall back to the unpacked layout.
    return 128 // width if (width <= 128 and 128 % width == 0) else 1


def _pick_tm(np_rows):
    # Biggest row tile under the cap with an EVEN grid-step count (balances v7x's two
    # TensorCores), >=4 steps when rows allow (each core keeps >=2 steps for
    # double-buffer overlap), and minimal tail padding.  tm is a multiple of 8 sublanes.
    if np_rows <= 8:
        return 8
    TM_CAP = 1024  # (1024, 256) f32 ~ 1 MiB/buffer: far under VMEM limits on all gens
    target_steps = 4 if np_rows >= 32 else 2
    steps = target_steps * max(1, pl.cdiv(np_rows, target_steps * TM_CAP))
    return _round_up(pl.cdiv(np_rows, steps), 8)


def temp_mlp_forward(data, kp, *, width, depth, output_dims):
    """Fused tempMLP forward. `kp` = packed kernel params from pack_params()."""
    if data.ndim == 3:
        batch_size, num_pixels, feat = data.shape
        x = data.reshape(-1, feat)
    else:
        batch_size, feat = data.shape
        num_pixels = None
        x = data
    assert feat == width
    n_rows = x.shape[0]

    pack = _pack_factor(width)
    lanes = pack * width
    np_rows = pl.cdiv(n_rows, pack)
    tm = _pick_tm(np_rows)
    np_pad = _round_up(np_rows, tm)
    n_pad = np_pad * pack
    if n_pad != n_rows:
        x = jnp.pad(x, ((0, n_pad - n_rows), (0, 0)))   # padded rows stay 0, sliced off
    xp = x.reshape(np_pad, lanes)   # zero-copy: `pack` consecutive rows per packed row

    has_out = output_dims is not None
    out_cols = pack * output_dims if has_out else lanes

    row_spec = pl.BlockSpec((tm, lanes), lambda i: (i, 0))
    full2 = lambda shape: pl.BlockSpec(shape, lambda i: (0, 0))
    full3 = lambda shape: pl.BlockSpec(shape, lambda i: (0, 0, 0))

    # TODO(synk): at large depth, mark the constant-index weight specs with
    # pipeline_mode=pl.Buffered(1) (or set vmem_limit_bytes) to halve resident weight
    # VMEM on v7x's 64 MiB; irrelevant at depth=2 so left at defaults here.
    in_specs = [
        row_spec,                                   # packed activations
        full2((lanes, lanes)),                      # segment-averaging matrix M (bf16)
        full3((depth, 1, lanes)),                   # g1
        full3((depth, 1, lanes)),                   # b1
        full3((depth, lanes, 2 * lanes)),           # [W1 | W1@M] (block-diag, bf16)
        full3((depth, 1, lanes)),                   # g2
        full3((depth, 1, lanes)),                   # b2
        full3((depth, lanes, lanes)),               # w2 (block-diag, bf16)
    ]
    args = [xp, kp["M"], kp["g1"], kp["b1"], kp["w1"], kp["g2"], kp["b2"], kp["w2"]]
    if has_out:
        in_specs.append(full2((lanes, out_cols)))   # output Linear (block-diag, bf16)
        args.append(kp["wo"])

    out = pl.pallas_call(
        _make_fused_kernel(depth, has_out),
        out_shape=jax.ShapeDtypeStruct((np_pad, out_cols), jnp.float32),
        grid=(np_pad // tm,),
        in_specs=in_specs,
        out_specs=pl.BlockSpec((tm, out_cols), lambda i: (i, 0)),
        compiler_params=pltpu.CompilerParams(dimension_semantics=("parallel",)),
    )(*args)

    out = out.reshape(n_pad, -1)[:n_rows]
    if num_pixels is not None:
        out = out.reshape(batch_size, num_pixels, -1)
    return out


# ---------------------------------------------------------------------------
# parameters (torch-equivalent init) + packing into the kernel layout
# ---------------------------------------------------------------------------
def init_linear_weight(key, in_features, out_features):
    # weight_initializer: trunc_normal(0, std, -2*std, 2*std), std = sqrt(1/fan_avg/10);
    # torch weight is (out, in) -> pre-transpose to (in, out) so the kernel does x @ W.
    fan_avg = 0.5 * (in_features + out_features)
    std = math.sqrt(1.0 / fan_avg / 10.0)
    w = jax.random.truncated_normal(key, -2.0, 2.0, (out_features, in_features),
                                    dtype=jnp.float32) * std
    return w.T


def make_params(key, width, depth, output_dims):
    layers = []
    for _ in range(depth):
        key, k1, k2 = jax.random.split(key, 3)
        layers.append(dict(
            g1=jnp.ones((width,), jnp.float32), b1=jnp.zeros((width,), jnp.float32),
            w1t=init_linear_weight(k1, width, width),
            g2=jnp.ones((width,), jnp.float32), b2=jnp.zeros((width,), jnp.float32),
            w2t=init_linear_weight(k2, width, width)))
    w_out_t = None
    if output_dims is not None:
        key, ko = jax.random.split(key)
        w_out_t = init_linear_weight(ko, width, output_dims)
    return layers, w_out_t


def pack_params(layers, w_out_t, width):
    """Stack per-layer params and pack them into the 128-lane block-diagonal layout."""
    pack = _pack_factor(width)
    lanes = pack * width
    eye = jnp.eye(pack, dtype=jnp.float32)
    # Block-diag averaging matrix (1/width is exact in bf16 for power-of-two widths).
    m_f32 = jnp.kron(eye, jnp.full((width, width), 1.0 / width, jnp.float32))

    def pack_mat(w):   # (width, out) -> (lanes, pack*out) block-diag, f32
        return jnp.kron(eye, w)

    def pack_vec(v):   # (width,) -> (1, lanes), f32 (LayerNorm math stays f32)
        return jnp.tile(v, pack).reshape(1, lanes)

    def pack_w1(w):    # fold norm2's mean into fc1: [W1 | W1 @ M], bf16 for the MXU
        wf = pack_mat(w)
        return jnp.concatenate([wf, wf @ m_f32], axis=1).astype(jnp.bfloat16)

    kp = dict(
        M=m_f32.astype(jnp.bfloat16),   # bf16 so LN-stat dots are single-pass MXU matmuls
        g1=jnp.stack([pack_vec(p["g1"]) for p in layers]),
        b1=jnp.stack([pack_vec(p["b1"]) for p in layers]),
        w1=jnp.stack([pack_w1(p["w1t"]) for p in layers]),
        g2=jnp.stack([pack_vec(p["g2"]) for p in layers]),
        b2=jnp.stack([pack_vec(p["b2"]) for p in layers]),
        w2=jnp.stack([pack_mat(p["w2t"]).astype(jnp.bfloat16) for p in layers]),
    )
    if w_out_t is not None:
        kp["wo"] = pack_mat(w_out_t).astype(jnp.bfloat16)
    return kp


# ---------------------------------------------------------------------------
# pure-JAX f32 reference (matches the torch module)
# ---------------------------------------------------------------------------
def _layernorm_ref(x, g, b):
    mu = jnp.mean(x, axis=-1, keepdims=True)
    xc = x - mu
    var = jnp.mean(xc * xc, axis=-1, keepdims=True)
    return xc * jax.lax.rsqrt(var + LN_EPS) * g + b


def temp_mlp_reference(data, layers, w_out_t):
    if data.ndim == 3:
        b, p, f = data.shape
        x = data.reshape(-1, f)
    else:
        p = None
        x = data
    for lyr in layers:
        res = x
        h = _layernorm_ref(x, lyr["g1"], lyr["b1"])
        h = jnp.maximum(h, 0.0)
        h = h @ lyr["w1t"]
        h = _layernorm_ref(h, lyr["g2"], lyr["b2"])
        h = jnp.maximum(h, 0.0)
        h = h @ lyr["w2t"]
        x = jnp.maximum(h + res, 0.0)
    if w_out_t is not None:
        x = x @ w_out_t
    if p is not None:
        x = x.reshape(b, p, -1)
    return x


if __name__ == "__main__":
    width, depth, output_dims = 32, 2, 4
    batch, num_pixels = 2, 8          # N = 16 rows

    key = jax.random.PRNGKey(0)
    key, kx, kparam = jax.random.split(key, 3)
    x = jax.random.normal(kx, (batch, num_pixels, width), dtype=jnp.float32)

    layers, w_out_t = make_params(kparam, width, depth, output_dims)
    kp = pack_params(layers, w_out_t, width)

    fwd = jax.jit(temp_mlp_forward, static_argnames=("width", "depth", "output_dims"))
    out = fwd(x, kp, width=width, depth=depth, output_dims=output_dims)
    jax.block_until_ready(out)

    assert out.shape == (batch, num_pixels, output_dims)
    ref = temp_mlp_reference(x, layers, w_out_t)
    # bf16 MXU matmuls (fc AND LayerNorm stats, f32 accumulate) vs pure-f32 reference
    # -> loose but meaningful tolerance.
    assert jnp.allclose(out, ref, atol=4e-2, rtol=4e-2)
    print("KERNEL_OK")
</pallas_src>

<mosaic_0001>
module attributes {stable_mosaic.version = 11 : i64} {
  func.func @kernel(%arg0: i32, %arg1: memref<8x128xf32, #tpu.memory_space<vmem>>, %arg2: memref<128x128xbf16, #tpu.memory_space<vmem>>, %arg3: memref<2x1x128xf32, #tpu.memory_space<vmem>>, %arg4: memref<2x1x128xf32, #tpu.memory_space<vmem>>, %arg5: memref<2x128x256xbf16, #tpu.memory_space<vmem>>, %arg6: memref<2x1x128xf32, #tpu.memory_space<vmem>>, %arg7: memref<2x1x128xf32, #tpu.memory_space<vmem>>, %arg8: memref<2x128x128xbf16, #tpu.memory_space<vmem>>, %arg9: memref<128x16xbf16, #tpu.memory_space<vmem>>, %arg10: memref<8x16xf32, #tpu.memory_space<vmem>>) attributes {dimension_semantics = [#tpu.dimension_semantics<parallel>], iteration_bounds = array<i64: 1>, scalar_prefetch = 0 : i64, scratch_operands = 0 : i64, tpu.core_type = #tpu.core_type<tc>, window_params = [{transform_indices = @transform_0, window_bounds = array<i64: 8, 128>}, {pipeline_mode = #tpu.pipeline_mode<synchronous>, transform_indices = @transform_1, window_bounds = array<i64: 128, 128>}, {pipeline_mode = #tpu.pipeline_mode<synchronous>, transform_indices = @transform_2, window_bounds = array<i64: 2, 1, 128>}, {pipeline_mode = #tpu.pipeline_mode<synchronous>, transform_indices = @transform_3, window_bounds = array<i64: 2, 1, 128>}, {pipeline_mode = #tpu.pipeline_mode<synchronous>, transform_indices = @transform_4, window_bounds = array<i64: 2, 128, 256>}, {pipeline_mode = #tpu.pipeline_mode<synchronous>, transform_indices = @transform_5, window_bounds = array<i64: 2, 1, 128>}, {pipeline_mode = #tpu.pipeline_mode<synchronous>, transform_indices = @transform_6, window_bounds = array<i64: 2, 1, 128>}, {pipeline_mode = #tpu.pipeline_mode<synchronous>, transform_indices = @transform_7, window_bounds = array<i64: 2, 128, 128>}, {pipeline_mode = #tpu.pipeline_mode<synchronous>, transform_indices = @transform_8, window_bounds = array<i64: 128, 16>}, {transform_indices = @transform_9, window_bounds = array<i64: 8, 16>}]} {
    %c0 = arith.constant 0 : index
    %c0_0 = arith.constant 0 : index
    %0 = vector.load %arg1[%c0, %c0_0] : memref<8x128xf32, #tpu.memory_space<vmem>>, vector<8x128xf32>
    %c0_1 = arith.constant 0 : index
    %c0_2 = arith.constant 0 : index
    %1 = vector.load %arg2[%c0_1, %c0_2] : memref<128x128xbf16, #tpu.memory_space<vmem>>, vector<128x128xbf16>
    %2 = arith.truncf %0 : vector<8x128xf32> to vector<8x128xbf16>
    %cst = arith.constant dense<0.000000e+00> : vector<8x128xf32>
    %3 = tpu.matmul %2, %1, %cst {dimension_numbers = #tpu.dot_dimension_numbers<[1], [0], [0], [1], [0, 0, 1, 1], [], []>} : vector<8x128xbf16>, vector<128x128xbf16>, vector<8x128xf32> -> vector<8x128xf32>
    %4 = arith.mulf %0, %0 : vector<8x128xf32>
    %5 = arith.truncf %4 : vector<8x128xf32> to vector<8x128xbf16>
    %cst_3 = arith.constant dense<0.000000e+00> : vector<8x128xf32>
    %6 = tpu.matmul %5, %1, %cst_3 {dimension_numbers = #tpu.dot_dimension_numbers<[1], [0], [0], [1], [0, 0, 1, 1], [], []>} : vector<8x128xbf16>, vector<128x128xbf16>, vector<8x128xf32> -> vector<8x128xf32>
    %c0_4 = arith.constant 0 : index
    %c0_5 = arith.constant 0 : index
    %c0_6 = arith.constant 0 : index
    %7 = vector.load %arg3[%c0_4, %c0_5, %c0_6] : memref<2x1x128xf32, #tpu.memory_space<vmem>>, vector<1x1x128xf32>
    %8 = vector.shape_cast %7 : vector<1x1x128xf32> to vector<1x128xf32>
    %c0_7 = arith.constant 0 : index
    %c0_8 = arith.constant 0 : index
    %c0_9 = arith.constant 0 : index
    %9 = vector.load %arg4[%c0_7, %c0_8, %c0_9] : memref<2x1x128xf32, #tpu.memory_space<vmem>>, vector<1x1x128xf32>
    %10 = vector.shape_cast %9 : vector<1x1x128xf32> to vector<1x128xf32>
    %11 = arith.mulf %3, %3 : vector<8x128xf32>
    %12 = arith.subf %6, %11 : vector<8x128xf32>
    %cst_10 = arith.constant 0.000000e+00 : f32
    %13 = vector.broadcast %cst_10 : f32 to vector<8x128xf32>
    %14 = arith.maximumf %12, %13 : vector<8x128xf32>
    %15 = arith.subf %0, %3 : vector<8x128xf32>
    %cst_11 = arith.constant 9.99999974E-6 : f32
    %16 = vector.broadcast %cst_11 : f32 to vector<8x128xf32>
    %17 = arith.addf %14, %16 : vector<8x128xf32>
    %18 = math.rsqrt %17 : vector<8x128xf32>
    %19 = arith.mulf %15, %18 : vector<8x128xf32>
    %20 = vector.broadcast %8 : vector<1x128xf32> to vector<8x128xf32>
    %21 = arith.mulf %19, %20 : vector<8x128xf32>
    %22 = vector.broadcast %10 : vector<1x128xf32> to vector<8x128xf32>
    %23 = arith.addf %21, %22 : vector<8x128xf32>
    %cst_12 = arith.constant 0.000000e+00 : f32
    %24 = vector.broadcast %cst_12 : f32 to vector<8x128xf32>
    %25 = arith.maximumf %23, %24 : vector<8x128xf32>
    %26 = arith.truncf %25 : vector<8x128xf32> to vector<8x128xbf16>
    %c0_13 = arith.constant 0 : index
    %c0_14 = arith.constant 0 : index
    %c0_15 = arith.constant 0 : index
    %27 = vector.load %arg5[%c0_13, %c0_14, %c0_15] : memref<2x128x256xbf16, #tpu.memory_space<vmem>>, vector<1x128x256xbf16>
    %28 = vector.shape_cast %27 : vector<1x128x256xbf16> to vector<128x256xbf16>
    %cst_16 = arith.constant dense<0.000000e+00> : vector<8x256xf32>
    %29 = tpu.matmul %26, %28, %cst_16 {dimension_numbers = #tpu.dot_dimension_numbers<[1], [0], [0], [1], [0, 0, 1, 1], [], []>} : vector<8x128xbf16>, vector<128x256xbf16>, vector<8x256xf32> -> vector<8x256xf32>
    %30 = vector.extract_strided_slice %29 {offsets = [0, 0], sizes = [8, 128], strides = [1, 1]} : vector<8x256xf32> to vector<8x128xf32>
    %31 = vector.extract_strided_slice %29 {offsets = [0, 128], sizes = [8, 128], strides = [1, 1]} : vector<8x256xf32> to vector<8x128xf32>
    %32 = arith.mulf %30, %30 : vector<8x128xf32>
    %33 = arith.truncf %32 : vector<8x128xf32> to vector<8x128xbf16>
    %c0_17 = arith.constant 0 : index
    %c0_18 = arith.constant 0 : index
    %34 = vector.load %arg2[%c0_17, %c0_18] : memref<128x128xbf16, #tpu.memory_space<vmem>>, vector<128x128xbf16>
    %cst_19 = arith.constant dense<0.000000e+00> : vector<8x128xf32>
    %35 = tpu.matmul %33, %34, %cst_19 {dimension_numbers = #tpu.dot_dimension_numbers<[1], [0], [0], [1], [0, 0, 1, 1], [], []>} : vector<8x128xbf16>, vector<128x128xbf16>, vector<8x128xf32> -> vector<8x128xf32>
    %c0_20 = arith.constant 0 : index
    %c0_21 = arith.constant 0 : index
    %c0_22 = arith.constant 0 : index
    %36 = vector.load %arg6[%c0_20, %c0_21, %c0_22] : memref<2x1x128xf32, #tpu.memory_space<vmem>>, vector<1x1x128xf32>
    %37 = vector.shape_cast %36 : vector<1x1x128xf32> to vector<1x128xf32>
    %c0_23 = arith.constant 0 : index
    %c0_24 = arith.constant 0 : index
    %c0_25 = arith.constant 0 : index
    %38 = vector.load %arg7[%c0_23, %c0_24, %c0_25] : memref<2x1x128xf32, #tpu.memory_space<vmem>>, vector<1x1x128xf32>
    %39 = vector.shape_cast %38 : vector<1x1x128xf32> to vector<1x128xf32>
    %40 = arith.mulf %31, %31 : vector<8x128xf32>
    %41 = arith.subf %35, %40 : vector<8x128xf32>
    %cst_26 = arith.constant 0.000000e+00 : f32
    %42 = vector.broadcast %cst_26 : f32 to vector<8x128xf32>
    %43 = arith.maximumf %41, %42 : vector<8x128xf32>
    %44 = arith.subf %30, %31 : vector<8x128xf32>
    %cst_27 = arith.constant 9.99999974E-6 : f32
    %45 = vector.broadcast %cst_27 : f32 to vector<8x128xf32>
    %46 = arith.addf %43, %45 : vector<8x128xf32>
    %47 = math.rsqrt %46 : vector<8x128xf32>
    %48 = arith.mulf %44, %47 : vector<8x128xf32>
    %49 = vector.broadcast %37 : vector<1x128xf32> to vector<8x128xf32>
    %50 = arith.mulf %48, %49 : vector<8x128xf32>
    %51 = vector.broadcast %39 : vector<1x128xf32> to vector<8x128xf32>
    %52 = arith.addf %50, %51 : vector<8x128xf32>
    %cst_28 = arith.constant 0.000000e+00 : f32
    %53 = vector.broadcast %cst_28 : f32 to vector<8x128xf32>
    %54 = arith.maximumf %52, %53 : vector<8x128xf32>
    %55 = arith.truncf %54 : vector<8x128xf32> to vector<8x128xbf16>
    %c0_29 = arith.constant 0 : index
    %c0_30 = arith.constant 0 : index
    %c0_31 = arith.constant 0 : index
    %56 = vector.load %arg8[%c0_29, %c0_30, %c0_31] : memref<2x128x128xbf16, #tpu.memory_space<vmem>>, vector<1x128x128xbf16>
    %57 = vector.shape_cast %56 : vector<1x128x128xbf16> to vector<128x128xbf16>
    %cst_32 = arith.constant dense<0.000000e+00> : vector<8x128xf32>
    %58 = tpu.matmul %55, %57, %cst_32 {dimension_numbers = #tpu.dot_dimension_numbers<[1], [0], [0], [1], [0, 0, 1, 1], [], []>} : vector<8x128xbf16>, vector<128x128xbf16>, vector<8x128xf32> -> vector<8x128xf32>
    %59 = arith.addf %58, %0 : vector<8x128xf32>
    %cst_33 = arith.constant 0.000000e+00 : f32
    %60 = vector.broadcast %cst_33 : f32 to vector<8x128xf32>
    %61 = arith.maximumf %59, %60 : vector<8x128xf32>
    %c0_34 = arith.constant 0 : index
    %c0_35 = arith.constant 0 : index
    %62 = vector.load %arg2[%c0_34, %c0_35] : memref<128x128xbf16, #tpu.memory_space<vmem>>, vector<128x128xbf16>
    %63 = arith.truncf %61 : vector<8x128xf32> to vector<8x128xbf16>
    %cst_36 = arith.constant dense<0.000000e+00> : vector<8x128xf32>
    %64 = tpu.matmul %63, %62, %cst_36 {dimension_numbers = #tpu.dot_dimension_numbers<[1], [0], [0], [1], [0, 0, 1, 1], [], []>} : vector<8x128xbf16>, vector<128x128xbf16>, vector<8x128xf32> -> vector<8x128xf32>
    %65 = arith.mulf %61, %61 : vector<8x128xf32>
    %66 = arith.truncf %65 : vector<8x128xf32> to vector<8x128xbf16>
    %cst_37 = arith.constant dense<0.000000e+00> : vector<8x128xf32>
    %67 = tpu.matmul %66, %62, %cst_37 {dimension_numbers = #tpu.dot_dimension_numbers<[1], [0], [0], [1], [0, 0, 1, 1], [], []>} : vector<8x128xbf16>, vector<128x128xbf16>, vector<8x128xf32> -> vector<8x128xf32>
    %c1 = arith.constant 1 : index
    %c0_38 = arith.constant 0 : index
    %c0_39 = arith.constant 0 : index
    %68 = vector.load %arg3[%c1, %c0_38, %c0_39] : memref<2x1x128xf32, #tpu.memory_space<vmem>>, vector<1x1x128xf32>
    %69 = vector.shape_cast %68 : vector<1x1x128xf32> to vector<1x128xf32>
    %c1_40 = arith.constant 1 : index
    %c0_41 = arith.constant 0 : index
    %c0_42 = arith.constant 0 : index
    %70 = vector.load %arg4[%c1_40, %c0_41, %c0_42] : memref<2x1x128xf32, #tpu.memory_space<vmem>>, vector<1x1x128xf32>
    %71 = vector.shape_cast %70 : vector<1x1x128xf32> to vector<1x128xf32>
    %72 = arith.mulf %64, %64 : vector<8x128xf32>
    %73 = arith.subf %67, %72 : vector<8x128xf32>
    %cst_43 = arith.constant 0.000000e+00 : f32
    %74 = vector.broadcast %cst_43 : f32 to vector<8x128xf32>
    %75 = arith.maximumf %73, %74 : vector<8x128xf32>
    %76 = arith.subf %61, %64 : vector<8x128xf32>
    %cst_44 = arith.constant 9.99999974E-6 : f32
    %77 = vector.broadcast %cst_44 : f32 to vector<8x128xf32>
    %78 = arith.addf %75, %77 : vector<8x128xf32>
    %79 = math.rsqrt %78 : vector<8x128xf32>
    %80 = arith.mulf %76, %79 : vector<8x128xf32>
    %81 = vector.broadcast %69 : vector<1x128xf32> to vector<8x128xf32>
    %82 = arith.mulf %80, %81 : vector<8x128xf32>
    %83 = vector.broadcast %71 : vector<1x128xf32> to vector<8x128xf32>
    %84 = arith.addf %82, %83 : vector<8x128xf32>
    %cst_45 = arith.constant 0.000000e+00 : f32
    %85 = vector.broadcast %cst_45 : f32 to vector<8x128xf32>
    %86 = arith.maximumf %84, %85 : vector<8x128xf32>
    %87 = arith.truncf %86 : vector<8x128xf32> to vector<8x128xbf16>
    %c1_46 = arith.constant 1 : index
    %c0_47 = arith.constant 0 : index
    %c0_48 = arith.constant 0 : index
    %88 = vector.load %arg5[%c1_46, %c0_47, %c0_48] : memref<2x128x256xbf16, #tpu.memory_space<vmem>>, vector<1x128x256xbf16>
    %89 = vector.shape_cast %88 : vector<1x128x256xbf16> to vector<128x256xbf16>
    %cst_49 = arith.constant dense<0.000000e+00> : vector<8x256xf32>
    %90 = tpu.matmul %87, %89, %cst_49 {dimension_numbers = #tpu.dot_dimension_numbers<[1], [0], [0], [1], [0, 0, 1, 1], [], []>} : vector<8x128xbf16>, vector<128x256xbf16>, vector<8x256xf32> -> vector<8x256xf32>
    %91 = vector.extract_strided_slice %90 {offsets = [0, 0], sizes = [8, 128], strides = [1, 1]} : vector<8x256xf32> to vector<8x128xf32>
    %92 = vector.extract_strided_slice %90 {offsets = [0, 128], sizes = [8, 128], strides = [1, 1]} : vector<8x256xf32> to vector<8x128xf32>
    %93 = arith.mulf %91, %91 : vector<8x128xf32>
    %94 = arith.truncf %93 : vector<8x128xf32> to vector<8x128xbf16>
    %c0_50 = arith.constant 0 : index
    %c0_51 = arith.constant 0 : index
    %95 = vector.load %arg2[%c0_50, %c0_51] : memref<128x128xbf16, #tpu.memory_space<vmem>>, vector<128x128xbf16>
    %cst_52 = arith.constant dense<0.000000e+00> : vector<8x128xf32>
    %96 = tpu.matmul %94, %95, %cst_52 {dimension_numbers = #tpu.dot_dimension_numbers<[1], [0], [0], [1], [0, 0, 1, 1], [], []>} : vector<8x128xbf16>, vector<128x128xbf16>, vector<8x128xf32> -> vector<8x128xf32>
    %c1_53 = arith.constant 1 : index
    %c0_54 = arith.constant 0 : index
    %c0_55 = arith.constant 0 : index
    %97 = vector.load %arg6[%c1_53, %c0_54, %c0_55] : memref<2x1x128xf32, #tpu.memory_space<vmem>>, vector<1x1x128xf32>
    %98 = vector.shape_cast %97 : vector<1x1x128xf32> to vector<1x128xf32>
    %c1_56 = arith.constant 1 : index
    %c0_57 = arith.constant 0 : index
    %c0_58 = arith.constant 0 : index
    %99 = vector.load %arg7[%c1_56, %c0_57, %c0_58] : memref<2x1x128xf32, #tpu.memory_space<vmem>>, vector<1x1x128xf32>
    %100 = vector.shape_cast %99 : vector<1x1x128xf32> to vector<1x128xf32>
    %101 = arith.mulf %92, %92 : vector<8x128xf32>
    %102 = arith.subf %96, %101 : vector<8x128xf32>
    %cst_59 = arith.constant 0.000000e+00 : f32
    %103 = vector.broadcast %cst_59 : f32 to vector<8x128xf32>
    %104 = arith.maximumf %102, %103 : vector<8x128xf32>
    %105 = arith.subf %91, %92 : vector<8x128xf32>
    %cst_60 = arith.constant 9.99999974E-6 : f32
    %106 = vector.broadcast %cst_60 : f32 to vector<8x128xf32>
    %107 = arith.addf %104, %106 : vector<8x128xf32>
    %108 = math.rsqrt %107 : vector<8x128xf32>
    %109 = arith.mulf %105, %108 : vector<8x128xf32>
    %110 = vector.broadcast %98 : vector<1x128xf32> to vector<8x128xf32>
    %111 = arith.mulf %109, %110 : vector<8x128xf32>
    %112 = vector.broadcast %100 : vector<1x128xf32> to vector<8x128xf32>
    %113 = arith.addf %111, %112 : vector<8x128xf32>
    %cst_61 = arith.constant 0.000000e+00 : f32
    %114 = vector.broadcast %cst_61 : f32 to vector<8x128xf32>
    %115 = arith.maximumf %113, %114 : vector<8x128xf32>
    %116 = arith.truncf %115 : vector<8x128xf32> to vector<8x128xbf16>
    %c1_62 = arith.constant 1 : index
    %c0_63 = arith.constant 0 : index
    %c0_64 = arith.constant 0 : index
    %117 = vector.load %arg8[%c1_62, %c0_63, %c0_64] : memref<2x128x128xbf16, #tpu.memory_space<vmem>>, vector<1x128x128xbf16>
    %118 = vector.shape_cast %117 : vector<1x128x128xbf16> to vector<128x128xbf16>
    %cst_65 = arith.constant dense<0.000000e+00> : vector<8x128xf32>
    %119 = tpu.matmul %116, %118, %cst_65 {dimension_numbers = #tpu.dot_dimension_numbers<[1], [0], [0], [1], [0, 0, 1, 1], [], []>} : vector<8x128xbf16>, vector<128x128xbf16>, vector<8x128xf32> -> vector<8x128xf32>
    %120 = arith.addf %119, %61 : vector<8x128xf32>
    %cst_66 = arith.constant 0.000000e+00 : f32
    %121 = vector.broadcast %cst_66 : f32 to vector<8x128xf32>
    %122 = arith.maximumf %120, %121 : vector<8x128xf32>
    %123 = arith.truncf %122 : vector<8x128xf32> to vector<8x128xbf16>
    %c0_67 = arith.constant 0 : index
    %c0_68 = arith.constant 0 : index
    %124 = vector.load %arg9[%c0_67, %c0_68] : memref<128x16xbf16, #tpu.memory_space<vmem>>, vector<128x16xbf16>
    %cst_69 = arith.constant dense<0.000000e+00> : vector<8x16xf32>
    %125 = tpu.matmul %123, %124, %cst_69 {dimension_numbers = #tpu.dot_dimension_numbers<[1], [0], [0], [1], [0, 0, 1, 1], [], []>} : vector<8x128xbf16>, vector<128x16xbf16>, vector<8x16xf32> -> vector<8x16xf32>
    %c0_70 = arith.constant 0 : index
    %c0_71 = arith.constant 0 : index
    %126 = vector.load %arg10[%c0_70, %c0_71] : memref<8x16xf32, #tpu.memory_space<vmem>>, vector<8x16xf32>
    tpu.vector_store %arg10[%c0_70, %c0_71], %125 {strides = array<i32>} : memref<8x16xf32, #tpu.memory_space<vmem>>, vector<8x16xf32>,
    return
  }
  func.func @transform_0(%arg0: i32) -> (i32, i32) {
    %c0_i32 = arith.constant 0 : i32
    %c0_i32_0 = arith.constant 0 : i32
    return %arg0, %c0_i32 : i32, i32
  }
  func.func @transform_1(%arg0: i32) -> (i32, i32) {
    %c0_i32 = arith.constant 0 : i32
    %c0_i32_0 = arith.constant 0 : i32
    %c0_i32_1 = arith.constant 0 : i32
    return %c0_i32, %c0_i32_0 : i32, i32
  }
  func.func @transform_2(%arg0: i32) -> (i32, i32, i32) {
    %c0_i32 = arith.constant 0 : i32
    %c0_i32_0 = arith.constant 0 : i32
    %c0_i32_1 = arith.constant 0 : i32
    %c0_i32_2 = arith.constant 0 : i32
    return %c0_i32, %c0_i32_0, %c0_i32_1 : i32, i32, i32
  }
  func.func @transform_3(%arg0: i32) -> (i32, i32, i32) {
    %c0_i32 = arith.constant 0 : i32
    %c0_i32_0 = arith.constant 0 : i32
    %c0_i32_1 = arith.constant 0 : i32
    %c0_i32_2 = arith.constant 0 : i32
    return %c0_i32, %c0_i32_0, %c0_i32_1 : i32, i32, i32
  }
  func.func @transform_4(%arg0: i32) -> (i32, i32, i32) {
    %c0_i32 = arith.constant 0 : i32
    %c0_i32_0 = arith.constant 0 : i32
    %c0_i32_1 = arith.constant 0 : i32
    %c0_i32_2 = arith.constant 0 : i32
    return %c0_i32, %c0_i32_0, %c0_i32_1 : i32, i32, i32
  }
  func.func @transform_5(%arg0: i32) -> (i32, i32, i32) {
    %c0_i32 = arith.constant 0 : i32
    %c0_i32_0 = arith.constant 0 : i32
    %c0_i32_1 = arith.constant 0 : i32
    %c0_i32_2 = arith.constant 0 : i32
    return %c0_i32, %c0_i32_0, %c0_i32_1 : i32, i32, i32
  }
  func.func @transform_6(%arg0: i32) -> (i32, i32, i32) {
    %c0_i32 = arith.constant 0 : i32
    %c0_i32_0 = arith.constant 0 : i32
    %c0_i32_1 = arith.constant 0 : i32
    %c0_i32_2 = arith.constant 0 : i32
    return %c0_i32, %c0_i32_0, %c0_i32_1 : i32, i32, i32
  }
  func.func @transform_7(%arg0: i32) -> (i32, i32, i32) {
    %c0_i32 = arith.constant 0 : i32
    %c0_i32_0 = arith.constant 0 : i32
    %c0_i32_1 = arith.constant 0 : i32
    %c0_i32_2 = arith.constant 0 : i32
    return %c0_i32, %c0_i32_0, %c0_i32_1 : i32, i32, i32
  }
  func.func @transform_8(%arg0: i32) -> (i32, i32) {
    %c0_i32 = arith.constant 0 : i32
    %c0_i32_0 = arith.constant 0 : i32
    %c0_i32_1 = arith.constant 0 : i32
    return %c0_i32, %c0_i32_0 : i32, i32
  }
  func.func @transform_9(%arg0: i32) -> (i32, i32) {
    %c0_i32 = arith.constant 0 : i32
    %c0_i32_0 = arith.constant 0 : i32
    return %arg0, %c0_i32 : i32, i32
  }
}

</mosaic_0001>

<bundles_post_ra>
// kernel: temp_mlp_forward.1
= control target key start
LH: loop header
LB: loop body
LE: loop exit
PB: predicated region body
PF: predicated region fallthrough
CT: control target
= control target key end

     0   :  { %14 = vsyncpa [#allocation3], 0  ;;  %s1439_s0 = inlined_call_operand.vmem [shape: f32[8,128], index: 0, kind: input, shape index: {}]   ;;  %s1440_s1 = inlined_call_operand.vmem [shape: bf16[128,128], index: 1, kind: input, shape index: {}]   ;;  %s1441_s2 = inlined_call_operand.vmem [shape: f32[2,1,128], index: 2, kind: input, shape index: {}]   ;;  %s1442_s3 = inlined_call_operand.vmem [shape: f32[2,1,128], index: 3, kind: input, shape index: {}]   ;;  %s1443_s4 = inlined_call_operand.hbm [shape: bf16[2,128,256], index: 4, kind: input, shape index: {}]   ;;  %s1444_s5 = inlined_call_operand.vmem [shape: f32[2,1,128], index: 5, kind: input, shape index: {}]   ;;  %s1445_s6 = inlined_call_operand.vmem [shape: f32[2,1,128], index: 6, kind: input, shape index: {}]   ;;  %s1446_s7 = inlined_call_operand.hbm [shape: bf16[2,128,128], index: 7, kind: input, shape index: {}]   ;;  %s1447_s8 = inlined_call_operand.vmem [shape: bf16[128,16], index: 8, kind: input, shape index: {}]   ;;  %s1448_s9 = inlined_call_operand.vmem [shape: f32[8,16], index: 9, kind: output, shape index: {}]  }
   0x1   :  { %s28_s11 = sshll.u32 %s1443_s4, 4  ;;  %s29_s11 = int_to_ptr.hbm [resolvable:$true] %s28_s11 }
   0x2   :  { %15 = vsyncpa [#allocation5], 0  ;;  %s1219_s12 = smov [#allocation2]   ;;  %s45_s16 = sshll.u32 %s1446_s7, 4  ;;  %s46_s16 = int_to_ptr.hbm [resolvable:$true] %s45_s16 }
   0x3   :  { %s30_s13 = sshll.u32 %s1219_s12, 4  ;;  %s1220_s17 = smov 128   ;;  %s31_s13 = int_to_ptr.vmem [resolvable:$true] %s30_s13 }
   0x4   :  { %s1221_s18 = smov 8   ;;  %s1222_s19 = smov [#allocation4]  }
   0x5   :  { %36 = dma.hbm_to_vmem [thread:$0]  %s29_s11, 4096, %s31_s13, [#allocation3], %s1220_s17, %s1220_s17, %s1221_s18  }
   0x6   :  { %s47_s20 = sshll.u32 %s1222_s19, 4  ;;  %s1223_s21 = smov 64   ;;  %s48_s20 = int_to_ptr.vmem [resolvable:$true] %s47_s20 }
   0x7   :  { %s1224_s22 = smov 4  }
   0x8   :  { %53 = dma.hbm_to_vmem [thread:$0]  %s46_s16, 2048, %s48_s20, [#allocation5], %s1223_s21, %s1223_s21, %s1224_s22  }
   0x9   :  { %1215 = dma.done.wait [#allocation3], 4096  }
   0xa   :  { %1216 = vsyncadd [#allocation3], 4294963200 }
   0xb   :  { %1217 = dma.done.wait [#allocation5], 2048  }
   0xc   :  { %1218 = vsyncadd [#allocation5], 4294965248  ;;  %v1284_v0 = vld [vmem:[%s1440_s1 + $0x38] sm:$0xff]  ;;  %v1291_v1 = vld [vmem:[%s1440_s1 + $0x30] sm:$0xff]  ;;  %vm813_vm12 = vcmask 130048  }
   0xd   :  { %130 = vmatpush.bf16.msra.mxu0 %v1284_v0  ;;  %145 = vmatpush.bf16.msra.mxu1 %v1284_v0  ;;  %v1298_v2 = vld [vmem:[%s1440_s1 + $0x28] sm:$0xff]  ;;  %v1305_v3 = vld [vmem:[%s1440_s1 + $0x20] sm:$0xff]  ;;  %v1312_v4 = vld [vmem:[%s1440_s1 + $0x18] sm:$0xff] }
   0xe   :  { %v1319_v5 = vld [vmem:[%s1440_s1 + $0x10] sm:$0xff]  ;;  %v1326_v6 = vld [vmem:[%s1440_s1 + $0x8] sm:$0xff]  ;;  %v1331_v7 = vld [vmem:[%s1439_s0] sm:$0xff] }
   0xf   :  { %v143_v8 = vmul.f32 %v1331_v7, %v1331_v7  ;;  %v1340_v9 = vld [vmem:[%s1440_s1] sm:$0xff]  ;;  %v81_v10 = vpack.c.bf16 %v1331_v7, %v1331_v7  ;;  %v911_v12 = vld [vmem:[#allocation2 + $0x70] sm:$0xf]  ;;  %v1104_v13 = vld [vmem:[#allocation2 + $0x74] sm:$0xf0] }
  0x10   :  { %v1103_v14 = vld [vmem:[#allocation2 + $0x74] sm:$0xf]  ;;  %v912_v15 = vor.u32 %v1104_v13, %v911_v12  ;;  %v913_v16 = vld [vmem:[#allocation2 + $0x78] sm:$0xf0]  ;;  %v903_v18 = vld [vmem:[#allocation2 + $0x60] sm:$0xf] }
  0x11   :  { %131 = vmatpush.bf16.msra.mxu0 %v1291_v1  ;;  %146 = vmatpush.bf16.msra.mxu1 %v1291_v1  ;;  %v144_v11 = vpack.c.bf16 %v143_v8, %v143_v8  ;;  %v916_v17 = vor.u32 %v1103_v14, %v913_v16  ;;  %v1102_v19 = vld [vmem:[#allocation2 + $0x64] sm:$0xf0]  ;;  %v1101_v20 = vld [vmem:[#allocation2 + $0x64] sm:$0xf]  ;;  %v905_v22 = vld [vmem:[#allocation2 + $0x68] sm:$0xf0] }
  0x12   :  { %282 = vmatpush.bf16.msra.mxu2 %v912_v15  ;;  %v904_v21 = vor.u32 %v1102_v19, %v903_v18  ;;  %v908_v23 = vor.u32 %v1101_v20, %v905_v22  ;;  %v895_v24 = vld [vmem:[#allocation2 + $0x50] sm:$0xf]  ;;  %v1100_v25 = vld [vmem:[#allocation2 + $0x54] sm:$0xf0]  ;;  %v1099_v26 = vld [vmem:[#allocation2 + $0x54] sm:$0xf] }
  0x13   :  { %295 = vmatpush.bf16.msra.mxu3 %v916_v17  ;;  %v896_v27 = vor.u32 %v1100_v25, %v895_v24  ;;  %v897_v28 = vld [vmem:[#allocation2 + $0x58] sm:$0xf0]  ;;  %v887_v30 = vld [vmem:[#allocation2 + $0x40] sm:$0xf]  ;;  %v1098_v31 = vld [vmem:[#allocation2 + $0x44] sm:$0xf0] }
  0x14   :  { %v900_v29 = vor.u32 %v1099_v26, %v897_v28  ;;  %v1097_v32 = vld [vmem:[#allocation2 + $0x44] sm:$0xf]  ;;  %v888_v33 = vor.u32 %v1098_v31, %v887_v30  ;;  %v889_v34 = vld [vmem:[#allocation2 + $0x48] sm:$0xf0]  ;;  %v879_v36 = vld [vmem:[#allocation2 + $0x30] sm:$0xf] }
  0x15   :  { %132 = vmatpush.bf16.msra.mxu0 %v1298_v2  ;;  %147 = vmatpush.bf16.msra.mxu1 %v1298_v2  ;;  %v892_v35 = vor.u32 %v1097_v32, %v889_v34  ;;  %v1096_v37 = vld [vmem:[#allocation2 + $0x34] sm:$0xf0]  ;;  %v1095_v38 = vld [vmem:[#allocation2 + $0x34] sm:$0xf]  ;;  %v881_v40 = vld [vmem:[#allocation2 + $0x38] sm:$0xf0] }
  0x16   :  { %283 = vmatpush.bf16.msra.mxu2 %v904_v21  ;;  %v880_v39 = vor.u32 %v1096_v37, %v879_v36  ;;  %v884_v41 = vor.u32 %v1095_v38, %v881_v40  ;;  %v871_v42 = vld [vmem:[#allocation2 + $0x20] sm:$0xf]  ;;  %v1094_v43 = vld [vmem:[#allocation2 + $0x24] sm:$0xf0]  ;;  %v1093_v44 = vld [vmem:[#allocation2 + $0x24] sm:$0xf] }
  0x17   :  { %296 = vmatpush.bf16.msra.mxu3 %v908_v23  ;;  %v872_v45 = vor.u32 %v1094_v43, %v871_v42  ;;  %v873_v46 = vld [vmem:[#allocation2 + $0x28] sm:$0xf0]  ;;  %v863_v47 = vld [vmem:[#allocation2 + $0x10] sm:$0xf]  ;;  %v1092_v48 = vld [vmem:[#allocation2 + $0x14] sm:$0xf0] }
  0x18   :  { %v876_v49 = vor.u32 %v1093_v44, %v873_v46  ;;  %v1091_v50 = vld [vmem:[#allocation2 + $0x14] sm:$0xf]  ;;  %v865_v51 = vld [vmem:[#allocation2 + $0x18] sm:$0xf0]  ;;  %v864_v52 = vor.u32 %v1092_v48, %v863_v47  ;;  %v855_v54 = vld [vmem:[#allocation2] sm:$0xf] }
  0x19   :  { %133 = vmatpush.bf16.msra.mxu0 %v1305_v3  ;;  %148 = vmatpush.bf16.msra.mxu1 %v1305_v3  ;;  %v868_v53 = vor.u32 %v1091_v50, %v865_v51  ;;  %v1090_v55 = vld [vmem:[#allocation2 + $0x4] sm:$0xf0]  ;;  %v1089_v56 = vld [vmem:[#allocation2 + $0x4] sm:$0xf]  ;;  %v857_v57 = vld [vmem:[#allocation2 + $0x8] sm:$0xf0] }
  0x1a   :  { %284 = vmatpush.bf16.msra.mxu2 %v896_v27  ;;  %v856_v58 = vor.u32 %v1090_v55, %v855_v54  ;;  %v860_v59 = vor.u32 %v1089_v56, %v857_v57  ;;  %v1151_v20 = vld [vmem:[%s1441_s2] ss:$0 sm:$0xff] }
  0x1b   :  { %297 = vmatpush.bf16.msra.mxu3 %v900_v29  ;;  %v1152_v23 = vld [vmem:[%s1442_s3] ss:$0 sm:$0xff] }
  0x1c   :  { %v1105_v34 = vld [vmem:[#allocation4] sm:$0xff] }
  0x1d   :  { %134 = vmatpush.bf16.msra.mxu0 %v1312_v4  ;;  %149 = vmatpush.bf16.msra.mxu1 %v1312_v4  ;;  %v1153_v47 = vld [vmem:[%s1444_s5] ss:$0 sm:$0xff] }
  0x1e   :  { %285 = vmatpush.bf16.msra.mxu2 %v888_v33  ;;  %v1112_v33 = vld [vmem:[#allocation4 + $0x38] sm:$0xff]  ;;  %v1154_v50 = vld [vmem:[%s1445_s6] ss:$0 sm:$0xff] }
  0x1f   :  { %298 = vmatpush.bf16.msra.mxu3 %v892_v35 }
  0x21   :  { %135 = vmatpush.bf16.msra.mxu0 %v1319_v5  ;;  %150 = vmatpush.bf16.msra.mxu1 %v1319_v5 }
  0x22   :  { %286 = vmatpush.bf16.msra.mxu2 %v880_v39 }
  0x23   :  { %299 = vmatpush.bf16.msra.mxu3 %v884_v41 }
  0x25   :  { %136 = vmatpush.bf16.msra.mxu0 %v1326_v6  ;;  %151 = vmatpush.bf16.msra.mxu1 %v1326_v6 }
  0x26   :  { %287 = vmatpush.bf16.msra.mxu2 %v872_v45 }
  0x27   :  { %300 = vmatpush.bf16.msra.mxu3 %v876_v49 }
  0x29   :  { %137 = vmatpush.bf16.msra.mxu0 %v1340_v9  ;;  %152 = vmatpush.bf16.msra.mxu1 %v1340_v9 }
  0x2a   :  { %288 = vmatpush.bf16.msra.mxu2 %v864_v52 }
  0x2b   :  { %301 = vmatpush.bf16.msra.mxu3 %v868_v53 }
  0x2c   :  { %138 = vmatmul.bf16.vlgmr.msra.gmra.mxu0 %v81_v10  ;;  %153 = vmatmul.bf16.vlgmr.msra.gmra.mxu1 %v144_v11 }
  0x2d   :  { %310 = vmatpush.bf16.msrb.mxu0 %v1284_v0  ;;  %415 = vmatpush.bf16.msrb.mxu1 %v1112_v33 }
  0x2e   :  { %289 = vmatpush.bf16.msra.mxu2 %v856_v58 }
  0x2f   :  { %302 = vmatpush.bf16.msra.mxu3 %v860_v59 }
  0x31   :  { %311 = vmatpush.bf16.msrb.mxu0 %v1291_v1 }
  0x32   :  { %430 = vmatpush.bf16.msrb.mxu2 %v1284_v0 }
  0x33   :  { %445 = vmatpush.bf16.msrb.mxu3 %v1284_v0 }
  0x35   :  { %312 = vmatpush.bf16.msrb.mxu0 %v1298_v2 }
  0x36   :  { %431 = vmatpush.bf16.msrb.mxu2 %v1291_v1 }
  0x37   :  { %446 = vmatpush.bf16.msrb.mxu3 %v1291_v1 }
  0x39   :  { %313 = vmatpush.bf16.msrb.mxu0 %v1305_v3 }
  0x3a   :  { %432 = vmatpush.bf16.msrb.mxu2 %v1298_v2 }
  0x3b   :  { %447 = vmatpush.bf16.msrb.mxu3 %v1298_v2 }
  0x3d   :  { %314 = vmatpush.bf16.msrb.mxu0 %v1312_v4 }
  0x3e   :  { %433 = vmatpush.bf16.msrb.mxu2 %v1305_v3 }
  0x3f   :  { %448 = vmatpush.bf16.msrb.mxu3 %v1305_v3 }
  0x41   :  { %315 = vmatpush.bf16.msrb.mxu0 %v1319_v5 }
  0x42   :  { %434 = vmatpush.bf16.msrb.mxu2 %v1312_v4 }
  0x43   :  { %449 = vmatpush.bf16.msrb.mxu3 %v1312_v4 }
  0x45   :  { %316 = vmatpush.bf16.msrb.mxu0 %v1326_v6 }
  0x46   :  { %435 = vmatpush.bf16.msrb.mxu2 %v1319_v5 }
  0x47   :  { %450 = vmatpush.bf16.msrb.mxu3 %v1319_v5 }
  0x49   :  { %317 = vmatpush.bf16.msrb.mxu0 %v1340_v9 }
  0x4a   :  { %436 = vmatpush.bf16.msrb.mxu2 %v1326_v6 }
  0x4b   :  { %451 = vmatpush.bf16.msrb.mxu3 %v1326_v6 }
  0x4e   :  { %437 = vmatpush.bf16.msrb.mxu2 %v1340_v9 }
  0x4f   :  { %452 = vmatpush.bf16.msrb.mxu3 %v1340_v9 }
  0xa9   :  { %v139_v60 = vpop.f32.mrf.mxu0  ;;  %v154_v61 = vpop.f32.mrf.mxu1 }
  0xaa   :  { %v160_v62 = vmul.f32 %v139_v60, %v139_v60  ;;  %v163_v19 = vsub.f32 %v1331_v7, %v139_v60 }
  0xac   :  { %v161_v63 = vsub.f32 %v154_v61, %v160_v62  ;;  %v1009_v62 = vld [vmem:[#allocation2 + $0xf0] sm:$0xf] }
  0xae   :  { %v162_v8 = vmax.f32 %v161_v63, 0.0  ;;  %v1128_v63 = vld [vmem:[#allocation2 + $0xf4] sm:$0xf0] }
  0xb0   :  { %v164_v10 = vadd.f32 1e-05, %v162_v8  ;;  %v1127_v8 = vld [vmem:[#allocation2 + $0xf4] sm:$0xf] }
  0xb1   :  { %v141_v11 = vpop.f32.mrf.mxu0  ;;  %v156_v12 = vpop.f32.mrf.mxu1 }
  0xb2   :  { %1159 = vrsqrt.f32 %v164_v10  ;;  %vm171_vm1 = vweird.f32 %v164_v10  ;;  %v1011_v11 = vld [vmem:[#allocation2 + $0xf8] sm:$0xf0] }
  0xb3   :  { %v1014_v12 = vor.u32 %v1127_v8, %v1011_v11 }
  0xb8   :  { %v1160_v13 = vpop.eup %1159 }
  0xb9   :  { %v166_v14 = vmul.f32 %v1160_v13, %v164_v10  ;;  %vm172_vm0 = vweird.f32 %v1160_v13  ;;  %v1010_v10 = vor.u32 %v1128_v63, %v1009_v62  ;;  %v1155_v62 = vld [vmem:[%s1441_s2 + $0x1] ss:$0 sm:$0xff] }
  0xba   :  { %vm173_vm2 = vmor %vm171_vm1, %vm172_vm0 }
  0xbb   :  { %v167_v15 = vmul.f32 %v1160_v13, %v166_v14  ;;  %585 = vmatpush.bf16.msra.mxu0 %v1010_v10  ;;  %v1125_v14 = vld [vmem:[#allocation2 + $0xe4] sm:$0xf]  ;;  %v1156_v10 = vld [vmem:[%s1442_s3 + $0x1] ss:$0 sm:$0xff] }
  0xbd   :  { %v168_v16 = vmul.f32 0.5, %v167_v15 }
  0xbf   :  { %v169_v17 = vsub.f32 1.5, %v168_v16  ;;  %v1003_v16 = vld [vmem:[#allocation2 + $0xe8] sm:$0xf0] }
  0xc1   :  { %v170_v18 = vmul.f32 %v1160_v13, %v169_v17  ;;  %v1006_v17 = vor.u32 %v1125_v14, %v1003_v16 }
  0xc3   :  { %v174_v21 = vsel %vm173_vm2, %v1160_v13, %v170_v18  ;;  %v1126_v13 = vld [vmem:[#allocation2 + $0xe4] sm:$0xf0]  ;;  %v993_v18 = vld [vmem:[#allocation2 + $0xd0] sm:$0xf] }
  0xc4   :  { %v175_v22 = vmul.f32 %v174_v21, %v163_v19  ;;  %v1124_v19 = vld [vmem:[#allocation2 + $0xd4] sm:$0xf0] }
  0xc5   :  { %v994_v21 = vor.u32 %v1124_v19, %v993_v18 }
  0xc6   :  { %v179_v24 = vmul.f32 %v1151_v20, %v175_v22  ;;  %v1123_v20 = vld [vmem:[#allocation2 + $0xd4] sm:$0xf]  ;;  %v995_v22 = vld [vmem:[#allocation2 + $0xd8] sm:$0xf0] }
  0xc8   :  { %v183_v25 = vadd.f32 %v1152_v23, %v179_v24  ;;  %v998_v23 = vor.u32 %v1123_v20, %v995_v22  ;;  %v985_v24 = vld [vmem:[#allocation2 + $0xc0] sm:$0xf]  ;;  %v1135_v22 = vld [vmem:[#allocation4 + $0x70] sm:$0xff] }
  0xca   :  { %v184_v26 = vmax.f32 %v183_v25, 0.0  ;;  %v1122_v25 = vld [vmem:[#allocation2 + $0xc4] sm:$0xf0] }
  0xcc   :  { %v185_v27 = vpack.c.bf16 %v184_v26, %v184_v26  ;;  %v1121_v26 = vld [vmem:[#allocation2 + $0xc4] sm:$0xf] }
  0xce   :  { %290 = vmatmul.bf16.vlgmr.msra.gmra.mxu2 %v185_v27  ;;  %303 = vmatmul.bf16.vlgmr.msra.gmra.mxu3 %v185_v27  ;;  %v986_v27 = vor.u32 %v1122_v25, %v985_v24  ;;  %v1133_v24 = vld [vmem:[#allocation4 + $0x60] sm:$0xff]  ;;  %v1132_v25 = vld [vmem:[#allocation4 + $0x58] sm:$0xff] }
  0xcf   :  { %613 = vmatpush.bf16.msra.mxu2 %v1284_v0 }
  0xd3   :  { %614 = vmatpush.bf16.msra.mxu2 %v1291_v1 }
  0xd7   :  { %615 = vmatpush.bf16.msra.mxu2 %v1298_v2  ;;  %v1111_v2 = vld [vmem:[#allocation4 + $0x30] sm:$0xff] }
  0xd8   :  { %416 = vmatpush.bf16.msrb.mxu1 %v1111_v2  ;;  %v969_v2 = vld [vmem:[#allocation2 + $0xa0] sm:$0xf] }
  0xdb   :  { %616 = vmatpush.bf16.msra.mxu2 %v1305_v3  ;;  %v1110_v3 = vld [vmem:[#allocation4 + $0x28] sm:$0xff] }
  0xdc   :  { %417 = vmatpush.bf16.msrb.mxu1 %v1110_v3  ;;  %v1118_v3 = vld [vmem:[#allocation2 + $0xa4] sm:$0xf0] }
  0xdf   :  { %617 = vmatpush.bf16.msra.mxu2 %v1312_v4  ;;  %v1109_v4 = vld [vmem:[#allocation4 + $0x20] sm:$0xff] }
  0xe0   :  { %418 = vmatpush.bf16.msrb.mxu1 %v1109_v4  ;;  %v1117_v4 = vld [vmem:[#allocation2 + $0xa4] sm:$0xf] }
  0xe3   :  { %618 = vmatpush.bf16.msra.mxu2 %v1319_v5  ;;  %v1108_v5 = vld [vmem:[#allocation4 + $0x18] sm:$0xff] }
  0xe4   :  { %419 = vmatpush.bf16.msrb.mxu1 %v1108_v5  ;;  %v970_v5 = vor.u32 %v1118_v3, %v969_v2  ;;  %v1142_v3 = vld [vmem:[%s1447_s8 + $0x28] sm:$0xff] }
  0xe7   :  { %619 = vmatpush.bf16.msra.mxu2 %v1326_v6  ;;  %v1107_v6 = vld [vmem:[#allocation4 + $0x10] sm:$0xff] }
  0xe8   :  { %420 = vmatpush.bf16.msrb.mxu1 %v1107_v6  ;;  %v971_v6 = vld [vmem:[#allocation2 + $0xa8] sm:$0xf0] }
  0xeb   :  { %620 = vmatpush.bf16.msra.mxu2 %v1340_v9  ;;  %v1106_v9 = vld [vmem:[#allocation4 + $0x8] sm:$0xff] }
  0xec   :  { %421 = vmatpush.bf16.msrb.mxu1 %v1106_v9  ;;  %v974_v9 = vor.u32 %v1117_v4, %v971_v6 }
  0xf0   :  { %422 = vmatpush.bf16.msrb.mxu1 %v1105_v34  ;;  %v961_v34 = vld [vmem:[#allocation2 + $0x90] sm:$0xf] }
  0xf4   :  { %598 = vmatpush.bf16.msra.mxu1 %v1014_v12 }
  0xf8   :  { %599 = vmatpush.bf16.msra.mxu1 %v1006_v17 }
  0xfc   :  { %600 = vmatpush.bf16.msra.mxu1 %v998_v23  ;;  %v1134_v23 = vld [vmem:[#allocation4 + $0x68] sm:$0xff] }
 0x151   :  { %v291_v28 = vpop.f32.mrf.mxu2  ;;  %v304_v29 = vpop.f32.mrf.mxu3 }
 0x152   :  { %v308_v30 = vmul.f32 %v291_v28, %v291_v28  ;;  %v328_v31 = vsub.f32 %v291_v28, %v304_v29  ;;  %v325_v35 = vmul.f32 %v304_v29, %v304_v29  ;;  %v987_v28 = vld [vmem:[#allocation2 + $0xc8] sm:$0xf0] }
 0x153   :  { %v990_v29 = vor.u32 %v1121_v26, %v987_v28  ;;  %v1131_v26 = vld [vmem:[#allocation4 + $0x50] sm:$0xff]  ;;  %v1129_v28 = vld [vmem:[#allocation4 + $0x40] sm:$0xff] }
 0x154   :  { %v309_v32 = vpack.c.bf16 %v308_v30, %v308_v30  ;;  %v977_v30 = vld [vmem:[#allocation2 + $0xb0] sm:$0xf] }
 0x155   :  { %601 = vmatpush.bf16.msra.mxu1 %v990_v29 }
 0x156   :  { %318 = vmatmul.bf16.vlgmr.msrb.gmra.mxu0 %v309_v32  ;;  %v1119_v32 = vld [vmem:[#allocation2 + $0xb4] sm:$0xf] }
 0x159   :  { %v293_v0 = vpop.f32.mrf.mxu2  ;;  %v306_v1 = vpop.f32.mrf.mxu3 }
 0x15a   :  { %v979_v1 = vld [vmem:[#allocation2 + $0xb8] sm:$0xf0] }
 0x15b   :  { %v982_v33 = vor.u32 %v1119_v32, %v979_v1 }
 0x15d   :  { %602 = vmatpush.bf16.msra.mxu1 %v982_v33  ;;  %v1143_v33 = vld [vmem:[%s1447_s8 + $0x30] sm:$0xff] }
 0x161   :  { %603 = vmatpush.bf16.msra.mxu1 %v974_v9 }
 0x1d3   :  { %v319_v36 = vpop.f32.mrf.mxu0 }
 0x1d4   :  { %v326_v37 = vsub.f32 %v319_v36, %v325_v35  ;;  %v1116_v35 = vld [vmem:[#allocation2 + $0x94] sm:$0xf0]  ;;  %v1115_v36 = vld [vmem:[#allocation2 + $0x94] sm:$0xf] }
 0x1d6   :  { %v327_v38 = vmax.f32 %v326_v37, 0.0  ;;  %v962_v37 = vor.u32 %v1116_v35, %v961_v34  ;;  %v1140_v34 = vld [vmem:[%s1447_s8 + $0x18] sm:$0xff] }
 0x1d8   :  { %v329_v39 = vadd.f32 1e-05, %v327_v38  ;;  %v963_v38 = vld [vmem:[#allocation2 + $0x98] sm:$0xf0] }
 0x1da   :  { %1161 = vrsqrt.f32 %v329_v39  ;;  %vm336_vm4 = vweird.f32 %v329_v39 }
 0x1db   :  { %v321_v40 = vpop.f32.mrf.mxu0 }
 0x1dc   :  { %v1114_v40 = vld [vmem:[#allocation2 + $0x84] sm:$0xf0] }
 0x1e0   :  { %v1162_v41 = vpop.eup %1161 }
 0x1e1   :  { %v331_v42 = vmul.f32 %v1162_v41, %v329_v39  ;;  %vm337_vm3 = vweird.f32 %v1162_v41  ;;  %v953_v39 = vld [vmem:[#allocation2 + $0x80] sm:$0xf] }
 0x1e2   :  { %vm338_vm5 = vmor %vm336_vm4, %vm337_vm3 }
 0x1e3   :  { %v332_v43 = vmul.f32 %v1162_v41, %v331_v42  ;;  %v1113_v42 = vld [vmem:[#allocation2 + $0x84] sm:$0xf] }
 0x1e5   :  { %v333_v44 = vmul.f32 0.5, %v332_v43  ;;  %v955_v43 = vld [vmem:[#allocation2 + $0x88] sm:$0xf0] }
 0x1e7   :  { %v334_v45 = vsub.f32 1.5, %v333_v44  ;;  %v954_v44 = vor.u32 %v1114_v40, %v953_v39  ;;  %v1157_v39 = vld [vmem:[%s1444_s5 + $0x1] ss:$0 sm:$0xff] }
 0x1e9   :  { %v335_v46 = vmul.f32 %v1162_v41, %v334_v45  ;;  %v958_v45 = vor.u32 %v1113_v42, %v955_v43  ;;  %v1158_v42 = vld [vmem:[%s1445_s6 + $0x1] ss:$0 sm:$0xff] }
 0x1eb   :  { %v339_v48 = vsel %vm338_vm5, %v1162_v41, %v335_v46  ;;  %v966_v41 = vor.u32 %v1115_v36, %v963_v38 }
 0x1ec   :  { %v340_v49 = vmul.f32 %v339_v48, %v328_v31  ;;  %v1120_v31 = vld [vmem:[#allocation2 + $0xb4] sm:$0xf0] }
 0x1ed   :  { %v978_v0 = vor.u32 %v1120_v31, %v977_v30  ;;  %604 = vmatpush.bf16.msra.mxu1 %v966_v41 }
 0x1ee   :  { %v344_v51 = vmul.f32 %v1153_v47, %v340_v49 }
 0x1f0   :  { %v348_v52 = vadd.f32 %v1154_v50, %v344_v51 }
 0x1f1   :  { %605 = vmatpush.bf16.msra.mxu1 %v958_v45 }
 0x1f2   :  { %v349_v53 = vmax.f32 %v348_v52, 0.0 }
 0x1f4   :  { %v350_v54 = vpack.c.bf16 %v349_v53, %v349_v53 }
 0x1f6   :  { %423 = vmatmul.bf16.vlgmr.msrb.gmra.mxu1 %v350_v54 }
 0x273   :  { %v424_v55 = vpop.f32.mrf.mxu1 }
 0x274   :  { %v425_v56 = vadd.f32 %v424_v55, %v1331_v7  ;;  %v1001_v7 = vld [vmem:[#allocation2 + $0xe0] sm:$0xf] }
 0x275   :  { %v1002_v15 = vor.u32 %v1126_v13, %v1001_v7 }
 0x276   :  { %v1392_v57 = vmax.f32 %v425_v56, 0.0 }
 0x277   :  { %586 = vmatpush.bf16.msra.mxu0 %v1002_v15 }
 0x278   :  { %v429_v58 = vpack.c.bf16 %v1392_v57, %v1392_v57  ;;  %v443_v59 = vmul.f32 %v1392_v57, %v1392_v57 }
 0x27a   :  { %438 = vmatmul.bf16.vlgmr.msrb.gmra.mxu2 %v429_v58  ;;  %v444_v60 = vpack.c.bf16 %v443_v59, %v443_v59 }
 0x27b   :  { %v426_v61 = vpop.f32.mrf.mxu1  ;;  %587 = vmatpush.bf16.msra.mxu0 %v994_v21  ;;  %v1136_v21 = vld [vmem:[#allocation4 + $0x78] sm:$0xff] }
 0x27c   :  { %453 = vmatmul.bf16.vlgmr.msrb.gmra.mxu3 %v444_v60 }
 0x27d   :  { %721 = vmatpush.bf16.msra.mxu3 %v1136_v21 }
 0x27f   :  { %588 = vmatpush.bf16.msra.mxu0 %v986_v27  ;;  %v1130_v27 = vld [vmem:[#allocation4 + $0x48] sm:$0xff] }
 0x281   :  { %722 = vmatpush.bf16.msra.mxu3 %v1135_v22 }
 0x283   :  { %589 = vmatpush.bf16.msra.mxu0 %v978_v0  ;;  %v1144_v0 = vld [vmem:[%s1447_s8 + $0x38] sm:$0xff] }
 0x285   :  { %723 = vmatpush.bf16.msra.mxu3 %v1134_v23 }
 0x287   :  { %590 = vmatpush.bf16.msra.mxu0 %v970_v5  ;;  %v1141_v5 = vld [vmem:[%s1447_s8 + $0x20] sm:$0xff] }
 0x289   :  { %724 = vmatpush.bf16.msra.mxu3 %v1133_v24 }
 0x28b   :  { %591 = vmatpush.bf16.msra.mxu0 %v962_v37  ;;  %v1139_v37 = vld [vmem:[%s1447_s8 + $0x10] sm:$0xff] }
 0x28d   :  { %725 = vmatpush.bf16.msra.mxu3 %v1132_v25 }
 0x28f   :  { %592 = vmatpush.bf16.msra.mxu0 %v954_v44 }
 0x291   :  { %726 = vmatpush.bf16.msra.mxu3 %v1131_v26 }
 0x293   :  { %800 = vmatpush.bf16.msrb.mxu0 %v1144_v0 }
 0x295   :  { %727 = vmatpush.bf16.msra.mxu3 %v1130_v27 }
 0x297   :  { %801 = vmatpush.bf16.msrb.mxu0 %v1143_v33 }
 0x299   :  { %728 = vmatpush.bf16.msra.mxu3 %v1129_v28 }
 0x29b   :  { %802 = vmatpush.bf16.msrb.mxu0 %v1142_v3 }
 0x29f   :  { %803 = vmatpush.bf16.msrb.mxu0 %v1141_v5 }
 0x2a3   :  { %804 = vmatpush.bf16.msrb.mxu0 %v1140_v34 }
 0x2a7   :  { %805 = vmatpush.bf16.msrb.mxu0 %v1139_v37 }
 0x2fd   :  { %v439_v46 = vpop.f32.mrf.mxu2 }
 0x2fe   :  { %v462_v47 = vmul.f32 %v439_v46, %v439_v46  ;;  %v465_v61 = vsub.f32 %v1392_v57, %v439_v46 }
 0x2ff   :  { %v454_v48 = vpop.f32.mrf.mxu3 }
 0x300   :  { %v463_v49 = vsub.f32 %v454_v48, %v462_v47  ;;  %v1138_v47 = vld [vmem:[%s1447_s8 + $0x8] sm:$0xff]  ;;  %v1137_v48 = vld [vmem:[%s1447_s8] sm:$0xff] }
 0x301   :  { %806 = vmatpush.bf16.msrb.mxu0 %v1138_v47 }
 0x302   :  { %v464_v50 = vmax.f32 %v463_v49, 0.0 }
 0x304   :  { %v466_v51 = vadd.f32 1e-05, %v464_v50 }
 0x305   :  { %v441_v52 = vpop.f32.mrf.mxu2  ;;  %807 = vmatpush.bf16.msrb.mxu0 %v1137_v48 }
 0x306   :  { %1163 = vrsqrt.f32 %v466_v51  ;;  %vm473_vm7 = vweird.f32 %v466_v51 }
 0x307   :  { %v456_v53 = vpop.f32.mrf.mxu3 }
 0x30c   :  { %v1164_v54 = vpop.eup %1163 }
 0x30d   :  { %v468_v55 = vmul.f32 %v1164_v54, %v466_v51  ;;  %vm474_vm6 = vweird.f32 %v1164_v54 }
 0x30e   :  { %vm475_vm8 = vmor %vm473_vm7, %vm474_vm6 }
 0x30f   :  { %v469_v56 = vmul.f32 %v1164_v54, %v468_v55 }
 0x311   :  { %v470_v58 = vmul.f32 0.5, %v469_v56 }
 0x313   :  { %v471_v59 = vsub.f32 1.5, %v470_v58 }
 0x315   :  { %v472_v60 = vmul.f32 %v1164_v54, %v471_v59 }
 0x317   :  { %v476_v63 = vsel %vm475_vm8, %v1164_v54, %v472_v60 }
 0x318   :  { %v477_v8 = vmul.f32 %v476_v63, %v465_v61 }
 0x31a   :  { %v481_v11 = vmul.f32 %v1155_v62, %v477_v8 }
 0x31c   :  { %v485_v12 = vadd.f32 %v1156_v10, %v481_v11 }
 0x31e   :  { %v486_v7 = vmax.f32 %v485_v12, 0.0 }
 0x320   :  { %v487_v13 = vpack.c.bf16 %v486_v7, %v486_v7 }
 0x322   :  { %593 = vmatmul.bf16.vlgmr.msra.gmra.mxu0 %v487_v13  ;;  %606 = vmatmul.bf16.vlgmr.msra.gmra.mxu1 %v487_v13 }
 0x39f   :  { %v594_v14 = vpop.f32.mrf.mxu0  ;;  %v607_v15 = vpop.f32.mrf.mxu1 }
 0x3a0   :  { %v611_v16 = vmul.f32 %v594_v14, %v594_v14  ;;  %v633_v17 = vsub.f32 %v594_v14, %v607_v15  ;;  %v630_v29 = vmul.f32 %v607_v15, %v607_v15 }
 0x3a2   :  { %v612_v18 = vpack.c.bf16 %v611_v16, %v611_v16 }
 0x3a4   :  { %621 = vmatmul.bf16.vlgmr.msra.gmra.mxu2 %v612_v18 }
 0x3a7   :  { %v596_v19 = vpop.f32.mrf.mxu0  ;;  %v609_v20 = vpop.f32.mrf.mxu1 }
 0x427   :  { %v622_v30 = vpop.f32.mrf.mxu2 }
 0x428   :  { %v631_v31 = vsub.f32 %v622_v30, %v630_v29 }
 0x42a   :  { %v632_v32 = vmax.f32 %v631_v31, 0.0 }
 0x42c   :  { %v634_v1 = vadd.f32 1e-05, %v632_v32 }
 0x42e   :  { %1165 = vrsqrt.f32 %v634_v1  ;;  %vm641_vm10 = vweird.f32 %v634_v1 }
 0x42f   :  { %v624_v2 = vpop.f32.mrf.mxu2 }
 0x434   :  { %v1166_v4 = vpop.eup %1165 }
 0x435   :  { %v636_v6 = vmul.f32 %v1166_v4, %v634_v1  ;;  %vm642_vm9 = vweird.f32 %v1166_v4 }
 0x436   :  { %vm643_vm11 = vmor %vm641_vm10, %vm642_vm9 }
 0x437   :  { %v637_v9 = vmul.f32 %v1166_v4, %v636_v6 }
 0x439   :  { %v638_v35 = vmul.f32 0.5, %v637_v9 }
 0x43b   :  { %v639_v36 = vsub.f32 1.5, %v638_v35 }
 0x43d   :  { %v640_v38 = vmul.f32 %v1166_v4, %v639_v36 }
 0x43f   :  { %v644_v40 = vsel %vm643_vm11, %v1166_v4, %v640_v38 }
 0x440   :  { %v645_v41 = vmul.f32 %v644_v40, %v633_v17 }
 0x442   :  { %v649_v43 = vmul.f32 %v1157_v39, %v645_v41 }
 0x444   :  { %v653_v44 = vadd.f32 %v1158_v42, %v649_v43 }
 0x446   :  { %v654_v45 = vmax.f32 %v653_v44, 0.0 }
 0x448   :  { %v655_v46 = vpack.c.bf16 %v654_v45, %v654_v45 }
 0x44a   :  { %729 = vmatmul.bf16.vlgmr.msra.gmra.mxu3 %v655_v46 }
 0x4cd   :  { %v730_v49 = vpop.f32.mrf.mxu3 }
 0x4ce   :  { %v731_v50 = vadd.f32 %v730_v49, %v1392_v57 }
 0x4d0   :  { %v734_v51 = vmax.f32 %v731_v50, 0.0 }
 0x4d2   :  { %v735_v52 = vpack.c.bf16 %v734_v51, %v734_v51 }
 0x4d4   :  { %808 = vmatmul.bf16.vlgmr.msrb.gmra.mxu0 %v735_v52 }
 0x4d5   :  { %v732_v53 = vpop.f32.mrf.mxu3 }
 0x551   :  { %v809_v54 = vpop.f32.mrf.mxu0 }
 0x552   :  { %814 = vst.msk [vmem:[%s1448_s9] sm:$0xff] %vm813_vm12, %v809_v54 }
 0x559   :  { %v811_v55 = vpop.f32.mrf.mxu0 }
 0x55a   :  { %819 = vsyncpa [#allocation3], 1 }
 0x55b   :  { %820 = vsyncpa [#allocation5], 1 }

</bundles_post_ra>
